<compile_context>
chip_gen: v7x
topology: tpu7x:2x2x1
jax: 0.10.0
libtpu: 0.0.40
codegen_flags: <defaults>
</compile_context>

<pallas_src>
import math
import functools

import jax
import jax.numpy as jnp
from jax.experimental import pallas as pl
from jax.experimental.pallas import tpu as pltpu

_LANE = 128
_FULL_BLOCK_BYTES = 6 * (1 << 20)   # max per-block bytes for the single-block path
_TILE_BLOCK_BYTES = 4 * (1 << 20)   # max per-block bytes for the tiled path


# ---------------------------------------------------------------------------
# Kernels
# ---------------------------------------------------------------------------
def _adain_full_kernel(x_ref, ystat_ref, o_ref, *, eps):
    """One batch element, full (C, HW) feature map resident in VMEM."""
    x = x_ref[0].astype(jnp.float32)                     # (C, HW) f32 math
    hw = x.shape[-1]

    # Fused single-pass stats: sum and sum of squares in one sweep.
    s = jnp.sum(x, axis=-1, keepdims=True)               # (C, 1)
    sq = jnp.sum(x * x, axis=-1, keepdims=True)          # (C, 1)
    mean = s * (1.0 / hw)
    var = (sq - s * mean) / (hw - 1) + eps               # unbiased (PyTorch .var())
    inv_std = jax.lax.rsqrt(var)                         # EUP, not VALU divide

    ys = ystat_ref[0]                                    # (C, 2): [:,0]=y_std, [:,1]=y_mean
    scale = ys[:, 0:1] * inv_std                         # (C, 1)
    shift = ys[:, 1:2] - mean * scale                    # (C, 1)

    # 2 VPU ops / element instead of sub/div/mul/add.
    o_ref[0] = (x * scale + shift).astype(o_ref.dtype)


def _adain_tiled_kernel(x_ref, ystat_ref, o_ref,
                        sum_ref, sq_ref, scale_ref, shift_ref, *, eps, hw):
    """Two-pass variant: grid = (B, 2, n_hw_tiles).

    pass p==0 : accumulate per-channel sum / sumsq over HW tiles into scratch,
                finalize scale/shift on the last tile.
    pass p==1 : re-sweep the HW tiles and apply x*scale + shift (lane-dense store).
    """
    p = pl.program_id(1)
    t = pl.program_id(2)
    nt = pl.num_programs(2)

    @pl.when((p == 0) & (t == 0))
    def _():
        sum_ref[...] = jnp.zeros_like(sum_ref)
        sq_ref[...] = jnp.zeros_like(sq_ref)

    @pl.when(p == 0)
    def _():
        xt = x_ref[0].astype(jnp.float32)                # (C, thw)
        sum_ref[...] += jnp.sum(xt, axis=-1, keepdims=True)
        sq_ref[...] += jnp.sum(xt * xt, axis=-1, keepdims=True)

    @pl.when((p == 0) & (t == nt - 1))
    def _():
        s = sum_ref[...]
        mean = s * (1.0 / hw)
        var = (sq_ref[...] - s * mean) / (hw - 1) + eps
        inv_std = jax.lax.rsqrt(var)
        ys = ystat_ref[0]                                # (C, 2)
        scale = ys[:, 0:1] * inv_std
        scale_ref[...] = scale
        shift_ref[...] = ys[:, 1:2] - mean * scale

    @pl.when(p == 1)
    def _():
        xt = x_ref[0].astype(jnp.float32)
        o_ref[0] = (xt * scale_ref[...] + shift_ref[...]).astype(o_ref.dtype)


# ---------------------------------------------------------------------------
# Wrapper
# ---------------------------------------------------------------------------
def _vmem_limit(bytes_needed):
    return int(min(100 * (1 << 20), max(16 * (1 << 20), bytes_needed)))


def _y_stats(y, w_l1, b_l1, bs, ch, eps):
    """l1 projection + c_norm(y) in plain XLA (tiny): returns (B, C, 2) = [y_std, y_mean]."""
    d = w_l1.shape[1]
    y_flat = y.reshape(bs, d).astype(jnp.float32)
    # Lane-dense (B, D) @ (D, 4C); PyTorch layout: output index = c*4 + k.
    proj = (y_flat @ w_l1.astype(jnp.float32).T + b_l1.astype(jnp.float32)).reshape(bs, ch, 4)
    y_mean = jnp.mean(proj, axis=-1)
    y_std = jnp.sqrt(jnp.var(proj, axis=-1, ddof=1) + eps)
    return jnp.stack([y_std, y_mean], axis=-1)           # (B, C, 2) f32


def adain_forward(x, y, w_l1, b_l1, eps=1e-5, *, hw_tile=None):
    """x: (B, C, H, W); y: (B, *latent_shape); w_l1: (4*C, D); b_l1: (4*C,)."""
    bs, ch = x.shape[0], x.shape[1]
    hw = math.prod(x.shape[2:])
    d = w_l1.shape[1]
    assert y.shape[0] == bs and math.prod(y.shape[1:]) == d
    assert hw > 1, "AdaIN needs >1 spatial element (unbiased variance divides by HW-1)"

    ystat = _y_stats(y, w_l1, b_l1, bs, ch, eps)          # (B, C, 2) f32 (small)
    x_ = x.reshape(bs, ch, hw)                            # native dtype, no f32 pre-cast
    out_dtype = x.dtype
    itemsize = jnp.dtype(out_dtype).itemsize
    full_block_bytes = ch * hw * itemsize

    if hw_tile is None:
        hw_tile = 0
        if full_block_bytes > _FULL_BLOCK_BYTES:
            for cand in (4096, 2048, 1024, 512, 256, 128):
                if hw % cand == 0 and ch * cand * itemsize <= _TILE_BLOCK_BYTES:
                    hw_tile = cand
                    break
            # TODO(synk): HW not divisible by any lane-aligned tile -> falls back to the
            # full-block path; a masked-remainder tiled variant would be needed for that.

    if hw_tile:
        assert hw % hw_tile == 0 and hw_tile % _LANE == 0
        n_t = hw // hw_tile
        blk_bytes = ch * hw_tile * itemsize
        out = pl.pallas_call(
            functools.partial(_adain_tiled_kernel, eps=eps, hw=hw),
            out_shape=jax.ShapeDtypeStruct((bs, ch, hw), out_dtype),
            grid=(bs, 2, n_t),
            in_specs=[
                pl.BlockSpec((1, ch, hw_tile), lambda b, p, t: (b, 0, t)),
                pl.BlockSpec((1, ch, 2), lambda b, p, t: (b, 0, 0)),
            ],
            # During the stats pass (p==0) the output index stays pinned at tile 0 and is
            # never written, so no garbage is flushed; pass p==1 writes every tile.
            out_specs=pl.BlockSpec((1, ch, hw_tile), lambda b, p, t: (b, 0, t * p)),
            scratch_shapes=[
                pltpu.VMEM((ch, 1), jnp.float32),   # sum(x)
                pltpu.VMEM((ch, 1), jnp.float32),   # sum(x*x)
                pltpu.VMEM((ch, 1), jnp.float32),   # scale
                pltpu.VMEM((ch, 1), jnp.float32),   # shift
            ],
            compiler_params=pltpu.CompilerParams(
                dimension_semantics=("parallel", "arbitrary", "arbitrary"),
                vmem_limit_bytes=_vmem_limit(6 * blk_bytes + (4 << 20))),
        )(x_, ystat)
    else:
        out = pl.pallas_call(
            functools.partial(_adain_full_kernel, eps=eps),
            out_shape=jax.ShapeDtypeStruct((bs, ch, hw), out_dtype),
            grid=(bs,),
            in_specs=[
                pl.BlockSpec((1, ch, hw), lambda b: (b, 0, 0)),
                pl.BlockSpec((1, ch, 2), lambda b: (b, 0, 0)),
            ],
            out_specs=pl.BlockSpec((1, ch, hw), lambda b: (b, 0, 0)),
            compiler_params=pltpu.CompilerParams(
                dimension_semantics=("parallel",),
                vmem_limit_bytes=_vmem_limit(5 * full_block_bytes + (4 << 20))),
        )(x_, ystat)

    return out.reshape(x.shape)


# ---------------------------------------------------------------------------
# Pure-JAX reference mirroring the PyTorch forward
# ---------------------------------------------------------------------------
def adain_ref(x, y, w_l1, b_l1, eps=1e-5):
    bs, ch = x.shape[:2]
    x_ = x.reshape(bs, ch, -1)
    y_ = y.reshape(bs, -1) @ w_l1.T + b_l1
    y_ = y_.reshape(bs, ch, 4)

    def c_norm(t):
        var = jnp.var(t, axis=-1, ddof=1) + eps
        return jnp.sqrt(var), jnp.mean(t, axis=-1)

    x_std, x_mean = c_norm(x_)
    y_std, y_mean = c_norm(y_)
    x_std = x_std[:, :, None, None]
    x_mean = x_mean[:, :, None, None]
    y_std = y_std[:, :, None, None]
    y_mean = y_mean[:, :, None, None]
    return (x - x_mean) / x_std * y_std + y_mean


if __name__ == "__main__":
    # Small shapes consistent with the module:
    #   in_channel = 4, latent_shape = (4, 4, 4)  ->  flatten_dim = 64, l1: 64 -> 16
    bs, ch, H, W = 2, 4, 16, 16
    latent_shape = (4, 4, 4)
    d = math.prod(latent_shape)

    key = jax.random.PRNGKey(0)
    kx, ky, kw, kb = jax.random.split(key, 4)
    x = jax.random.normal(kx, (bs, ch, H, W), dtype=jnp.float32)
    y = jax.random.normal(ky, (bs,) + latent_shape, dtype=jnp.float32)
    bound = 1.0 / math.sqrt(d)
    w_l1 = jax.random.uniform(kw, (ch * 4, d), minval=-bound, maxval=bound, dtype=jnp.float32)
    b_l1 = jax.random.uniform(kb, (ch * 4,), minval=-bound, maxval=bound, dtype=jnp.float32)

    ref = jax.block_until_ready(adain_ref(x, y, w_l1, b_l1, eps=1e-5))

    # Default path: full (C, HW) block per batch element.
    out_full = jax.block_until_ready(adain_forward(x, y, w_l1, b_l1, eps=1e-5))
    assert out_full.shape == x.shape
    err_full = float(jnp.max(jnp.abs(out_full - ref)))
    assert jnp.allclose(out_full, ref, atol=1e-3, rtol=1e-3), err_full

    # Tiled two-pass path (used automatically for large H*W); force it here to verify.
    out_tiled = jax.block_until_ready(adain_forward(x, y, w_l1, b_l1, eps=1e-5, hw_tile=128))
    err_tiled = float(jnp.max(jnp.abs(out_tiled - ref)))
    assert jnp.allclose(out_tiled, ref, atol=1e-3, rtol=1e-3), err_tiled

    print("KERNEL_OK")
</pallas_src>

<mosaic_0001>
module attributes {stable_mosaic.version = 11 : i64} {
  func.func @_adain_full_kernel(%arg0: i32, %arg1: memref<1x4x256xf32, #tpu.memory_space<vmem>>, %arg2: memref<1x4x2xf32, #tpu.memory_space<vmem>>, %arg3: memref<1x4x256xf32, #tpu.memory_space<vmem>>) attributes {dimension_semantics = [#tpu.dimension_semantics<parallel>], iteration_bounds = array<i64: 2>, scalar_prefetch = 0 : i64, scratch_operands = 0 : i64, tpu.core_type = #tpu.core_type<tc>, window_params = [{transform_indices = @transform_0, window_bounds = array<i64: 1, 4, 256>}, {transform_indices = @transform_1, window_bounds = array<i64: 1, 4, 2>}, {transform_indices = @transform_2, window_bounds = array<i64: 1, 4, 256>}]} {
    %c0 = arith.constant 0 : index
    %c0_0 = arith.constant 0 : index
    %c0_1 = arith.constant 0 : index
    %0 = vector.load %arg1[%c0, %c0_0, %c0_1] : memref<1x4x256xf32, #tpu.memory_space<vmem>>, vector<1x4x256xf32>
    %1 = vector.shape_cast %0 : vector<1x4x256xf32> to vector<4x256xf32>
    %cst = arith.constant dense<0.000000e+00> : vector<4xf32>
    %2 = vector.multi_reduction <add>, %1, %cst [1] : vector<4x256xf32> to vector<4xf32>
    %3 = vector.shape_cast %2 : vector<4xf32> to vector<4x1xf32>
    %4 = arith.mulf %1, %1 : vector<4x256xf32>
    %cst_2 = arith.constant dense<0.000000e+00> : vector<4xf32>
    %5 = vector.multi_reduction <add>, %4, %cst_2 [1] : vector<4x256xf32> to vector<4xf32>
    %6 = vector.shape_cast %5 : vector<4xf32> to vector<4x1xf32>
    %cst_3 = arith.constant 3.906250e-03 : f32
    %7 = vector.broadcast %cst_3 : f32 to vector<4x1xf32>
    %8 = arith.mulf %3, %7 : vector<4x1xf32>
    %9 = arith.mulf %3, %8 : vector<4x1xf32>
    %10 = arith.subf %6, %9 : vector<4x1xf32>
    %cst_4 = arith.constant 2.550000e+02 : f32
    %11 = vector.broadcast %cst_4 : f32 to vector<4x1xf32>
    %12 = arith.divf %10, %11 : vector<4x1xf32>
    %cst_5 = arith.constant 9.99999974E-6 : f32
    %13 = vector.broadcast %cst_5 : f32 to vector<4x1xf32>
    %14 = arith.addf %12, %13 : vector<4x1xf32>
    %15 = math.rsqrt %14 : vector<4x1xf32>
    %c0_6 = arith.constant 0 : index
    %c0_7 = arith.constant 0 : index
    %c0_8 = arith.constant 0 : index
    %16 = vector.load %arg2[%c0_6, %c0_7, %c0_8] : memref<1x4x2xf32, #tpu.memory_space<vmem>>, vector<1x4x2xf32>
    %17 = vector.shape_cast %16 : vector<1x4x2xf32> to vector<4x2xf32>
    %18 = vector.extract_strided_slice %17 {offsets = [0, 0], sizes = [4, 1], strides = [1, 1]} : vector<4x2xf32> to vector<4x1xf32>
    %19 = arith.mulf %18, %15 : vector<4x1xf32>
    %20 = vector.extract_strided_slice %17 {offsets = [0, 1], sizes = [4, 1], strides = [1, 1]} : vector<4x2xf32> to vector<4x1xf32>
    %21 = arith.mulf %8, %19 : vector<4x1xf32>
    %22 = arith.subf %20, %21 : vector<4x1xf32>
    %23 = vector.broadcast %19 : vector<4x1xf32> to vector<4x256xf32>
    %24 = arith.mulf %1, %23 : vector<4x256xf32>
    %25 = vector.broadcast %22 : vector<4x1xf32> to vector<4x256xf32>
    %26 = arith.addf %24, %25 : vector<4x256xf32>
    %c0_9 = arith.constant 0 : index
    %c0_10 = arith.constant 0 : index
    %c0_11 = arith.constant 0 : index
    %27 = vector.load %arg3[%c0_9, %c0_10, %c0_11] : memref<1x4x256xf32, #tpu.memory_space<vmem>>, vector<1x4x256xf32>
    %28 = vector.shape_cast %27 : vector<1x4x256xf32> to vector<4x256xf32>
    %29 = vector.shape_cast %26 : vector<4x256xf32> to vector<1x4x256xf32>
    tpu.vector_store %arg3[%c0_9, %c0_10, %c0_11], %29 {strides = array<i32>} : memref<1x4x256xf32, #tpu.memory_space<vmem>>, vector<1x4x256xf32>,
    return
  }
  func.func @transform_0(%arg0: i32) -> (i32, i32, i32) {
    %c0_i32 = arith.constant 0 : i32
    %c0_i32_0 = arith.constant 0 : i32
    %c0_i32_1 = arith.constant 0 : i32
    return %arg0, %c0_i32, %c0_i32_0 : i32, i32, i32
  }
  func.func @transform_1(%arg0: i32) -> (i32, i32, i32) {
    %c0_i32 = arith.constant 0 : i32
    %c0_i32_0 = arith.constant 0 : i32
    %c0_i32_1 = arith.constant 0 : i32
    return %arg0, %c0_i32, %c0_i32_0 : i32, i32, i32
  }
  func.func @transform_2(%arg0: i32) -> (i32, i32, i32) {
    %c0_i32 = arith.constant 0 : i32
    %c0_i32_0 = arith.constant 0 : i32
    %c0_i32_1 = arith.constant 0 : i32
    return %arg0, %c0_i32, %c0_i32_0 : i32, i32, i32
  }
}

</mosaic_0001>

<bundles_post_ra>
// kernel: tpu_custom_call.1
= control target key start
LH: loop header
LB: loop body
LE: loop exit
PB: predicated region body
PF: predicated region fallthrough
CT: control target
= control target key end

     0   :  { %7 = vsyncpa [#allocation3], 0  ;;  %s696_s0 = inlined_call_operand.hbm [shape: f32[2,4,256], index: 0, kind: input, shape index: {}]   ;;  %s697_s1 = inlined_call_operand.vmem [shape: f32[2,4,2], index: 1, kind: input, shape index: {}]   ;;  %s698_s2 = inlined_call_operand.hbm [shape: f32[2,4,256], index: 2, kind: output, shape index: {}]  }
   0x1   :  { %9 = vsyncpa [#allocation3 + $0x1], 0 }
   0x2   :  { %10 = vsyncpa [#allocation4], 0 }
   0x3   :  { %12 = vsyncpa [#allocation4 + $0x1], 0  ;;  %s526_s9 = smov 0   ;;  %s528_s10 = smov 0  }
   0x4   :  { %s530_s11 = smov 0   ;;  %s532_s12 = smov 0  }
   0x5 LB: > { %s547_s13 = sadd.s32 4294967295, %s503_s12   ;;  %s335_s14 = sadd.s32 4294967294, %s503_s12   ;;  %s503_s12 = sphi %s532_s12, %s713_s12   ;;  %s499_s11 = sphi %s530_s11, %s712_s11   ;;  %s495_s10 = sphi %s528_s10, %s711_s10   ;;  %s491_s9 = sphi %s526_s9, %s710_s9  }
   0x6   : > { %s551_s15 = sadd.s32 1, %s503_s12   ;;  %s25_s16 = sadd.s32 1, %s499_s11 }
   0x7   : > { %s22_s17 = ssub.s32 %s503_s12, %s551_s15  ;;  %p32_p0 = scmp.ne.s32.totalorder %s499_s11, %s495_s10 }
   0x8   : > { %p23_p1 = scmp.eq.s32.totalorder %s22_s17, 0  ;;  %p33_p2 = scmp.eq.s32.totalorder %s503_s12, 0 }
   0x9   : > { %p38_p3 = scmp.ne.s32.totalorder %s495_s10, %s491_s9  ;;  %p39_p4 = scmp.eq.s32.totalorder %s547_s13, 0 }
   0xa   : > { %s563_s18 = scalar_select %p23_p1, %s499_s11, %s25_s16  }
   0xb   : > { %p565_p5 = por %p33_p2, %p32_p0  ;;  %p569_p6 = por %p39_p4, %p38_p3 }
   0xc   : > { %p88_p7 = scmp.eq.s32.totalorder %s547_s13, 1  ;;  %p94_p8 = scmp.eq.s32.totalorder %s335_s14, 1 }
   0xd   : > { %p364_p10 = scmp.lt.s32.totalorder %s503_s12, 2  ;;  %s114_s23 = sand.u32 1, %s499_s11  }
   0xe   : > { %p576_p11 = por %p88_p7, %p32_p0  ;;  %p580_p12 = por %p94_p8, %p38_p3 }
   0xf   : > { %s350_s24 = sshll.u32 %s503_s12, 7  ;;  %s338_s25 = sshll.u32 %s114_s23, 3 }
  0x10   : > { %s702_s21 = scalar_select %p576_p11, 1, 0 }
  0x11   : > { %s703_s22 = scalar_select %p580_p12, 1, 0 }
  0x12   : > { %s589_s28 = scalar_lea.hbm %s696_s0, %s350_s24  ;;  %s118_s29 = scalar_lea.vmem [#allocation2], %s338_s25 }
  0x13   : > { %s126_s30 = sshll.u32 %s118_s29, 4  ;;  %p593_p13 = pnand %p364_p10, %p565_p5  ;;  %s597_s30 = int_to_ptr.vmem [resolvable:$true] %s126_s30 }
  0x14   : > { %s115_s4 = scalar_lea.sflag [#allocation3], %s114_s23  ;;  %s407_s5 = scalar_lea.hbm %s589_s28, 128 }
  0x15   : > { %p408_p2 = scmp.ne.s32.totalorder %s589_s28, %s407_s5  ;;  %p409_p3 = pneg %p593_p13 }
  0x16   : > { %s412_s8 = scalar_lea.hbm %s696_s0, 256  ;;  %p413_p5 = scmp.lt.u32.totalorder %s589_s28, %s696_s0 }
  0x17   : > { %p410_p4 = pnand %p409_p3, %p408_p2  ;;  %p414_p8 = scmp.lt.u32.totalorder %s412_s8, %s407_s5 }
  0x18   : > { %p416_p9 = scmp.lt.u32.totalorder %s407_s5, %s589_s28 }
  0x19   : > { %p411_p7 = pneg %p410_p4  ;;  %p415_p10 = por %p414_p8, %p413_p5 }
  0x1b   : > { %p417_p0 = por %p416_p9, %p415_p10 }
  0x1d   : > { %p418_p1 = pnand %p417_p0, %p411_p7 }
  0x1f   : > { %421 = shalt.err (!%p418_p1)
}
  0x20   : > { %s422_s17 = scalar_lea.vmem %s597_s30, 128  ;;  %s505_s19 = smov [#allocation2]  }
  0x21   : > { %p423_p2 = scmp.ne.s32.totalorder %s597_s30, %s422_s17  ;;  %s427_s23 = sshll.u32 %s505_s19, 4  ;;  %s428_s23 = int_to_ptr.vmem [resolvable:$false] %s427_s23 }
  0x22   : > { %s429_s24 = scalar_lea.vmem %s428_s23, 256  ;;  %p430_p11 = scmp.lt.s32.totalorder %s597_s30, %s428_s23 }
  0x23   : > { %p425_p4 = pnand %p423_p2, %p409_p3  ;;  %p431_p5 = scmp.lt.s32.totalorder %s429_s24, %s422_s17 }
  0x25   : > { %p426_p12 = pneg %p425_p4  ;;  %p432_p8 = por %p431_p5, %p430_p11 }
  0x27   : > { %p433_p9 = pnand %p432_p8, %p426_p12 }
  0x29   : > { %436 = shalt.err (!%p433_p9)
}
  0x2a   : > { %359 = dma.hbm_to_vmem [thread:$0]  (!%p593_p13), %s589_s28, 128, %s597_s30, %s115_s4  }
  0x2b   : > { %p705_p0 = scmp.lt.s32.totalorder %s503_s12, 3  ;;  %p706_p1 = scmp.ge.s32.totalorder %s503_s12, 1 }
  0x2d   : > { %p139_p3 = pnand %p706_p1, %p705_p0 }
  0x2e   : > { %s631_s25 = sand.u32 (!%p139_p3), 1, %s495_s10  }
  0x2f   : > { %142 = sbr.rel (%p139_p3) target bundleno = 491 (0x1eb), region = 28  ;;  %s342_s26 = sshll.u32 (!%p139_p3), %s631_s25, 3 }
  0x30   : > { %s145_s27 = scalar_lea.sflag (!%p139_p3), [#allocation3], %s631_s25  ;;  %s148_s29 = scalar_lea.vmem (!%p139_p3), [#allocation2], %s342_s26 }
  0x36   : > { %482 = dma.done.wait (%p569_p6), %s145_s27, 128  }
  0x37   : > { %484 = vsyncadd (%p569_p6), %s145_s27, 4294967168  ;;  %vm181_vm0 = vcmask 1043456   ;;  %v177_v0 = vld [vmem:[%s148_s29] sm:$0xff]  ;;  %v506_v10 = vmov 0   ;;  %p173_p6 = scmp.lt.s32.totalorder %s547_s13, 1  ;;  %v507_v18 = vmov 1   ;;  %v218_v27 = vlaneseq }
  0x38   : > { %v179_v1 = vcombine.high %v177_v0, %v177_v0  ;;  %v182_v2 = vsel %vm181_vm0, %v177_v0, 0.0  ;;  %v187_v3 = vmul.f32 %v177_v0, %v177_v0  ;;  %402 = vset.pattern.permute.xlu1 %v506_v10  ;;  %403 = vset.pattern.permute.xlu0 %v507_v18  ;;  %s508_s5 = smov 1   ;;  %v509_v25 = vmov 839922192   ;;  %s351_s6 = sshll.u32 %s547_s13, 7 }
  0x39   : > { %s174_s20 = scalar_select %p173_p6, %s547_s13, 1  ;;  %v216_v26 = vunpack.c.l.s4 %v509_v25  ;;  %v219_v29 = vshrl.u32 %v218_v27, 7 }
  0x3a   : > { %v183_v4 = vsel %vm181_vm0, %v179_v1, 0.0  ;;  %v189_v5 = vcombine.high %v187_v3, %v187_v3  ;;  %v191_v6 = vsel %vm181_vm0, %v187_v3, 0.0  ;;  %s172_s7 = scalar_lea.vmem [#allocation5], %s342_s26  ;;  %s652_s17 = scalar_lea.hbm %s698_s2, %s351_s6 }
  0x3b   : > { %v184_v7 = vadd.f32 %v183_v4, %v182_v2  ;;  %s344_s28 = sshll.u32 %s174_s20, 2  ;;  %v217_v28 = vunpack.c.0.s8 %v216_v26  ;;  %s253_s8 = sshll.u32 %s172_s7, 4  ;;  %s654_s8 = int_to_ptr.vmem [resolvable:$true] %s253_s8 }
  0x3c   : > { %v192_v8 = vsel %vm181_vm0, %v189_v5, 0.0  ;;  %s176_s4 = scalar_lea.vmem %s697_s1, %s344_s28  ;;  %s239_s19 = scalar_lea.sflag [#allocation4], %s631_s25 }
  0x3d   : > { %185 = vadd.xlane.f32.xlu0 %v184_v7  ;;  %v193_v9 = vadd.f32 %v192_v8, %v191_v6  ;;  %v203_v19 = vld [vmem:[%s176_s4] sm:$0xf]  ;;  %v220_v30 = vsub.s32 %v217_v28, %v219_v29  ;;  %s437_s23 = scalar_lea.vmem %s654_s8, 128  ;;  %p707_p12 = scmp.ne.s32.totalorder %s702_s21, 0 }
  0x3e   : > { %p438_p11 = scmp.ne.s32.totalorder %s654_s8, %s437_s23  ;;  %s510_s13 = smov [#allocation5]  }
  0x3f   : > { %s441_s24 = sshll.u32 %s510_s13, 4  ;;  %s442_s24 = int_to_ptr.vmem [resolvable:$false] %s441_s24 }
  0x40   : > { %p439_p13 = pnand %p438_p11, %p707_p12  ;;  %s443_s26 = scalar_lea.vmem %s442_s24, 256 }
  0x41   : > { %194 = vadd.xlane.f32.xlu0 %v193_v9  ;;  %p444_p10 = scmp.lt.s32.totalorder %s654_s8, %s442_s24  ;;  %p445_p2 = scmp.lt.s32.totalorder %s443_s26, %s437_s23 }
  0x42   : > { %p440_p7 = pneg %p439_p13 }
  0x43   : > { %p446_p4 = por %p445_p2, %p444_p10 }
  0x45   : > { %p447_p5 = pnand %p446_p4, %p440_p7 }
  0xca   : > { %v186_v11 = vpop.xlane.xlu0 %185 }
  0xcb   : > { %v196_v12 = vmul.f32 0.00390625, %v186_v11 }
  0xcd   : > { %v197_v13 = vmul.f32 %v196_v12, %v186_v11 }
  0xce   : > { %v195_v14 = vpop.xlane.xlu0 %194 }
  0xcf   : > { %v198_v15 = vsub.f32 %v195_v14, %v197_v13 }
  0xd1   : > { %v200_v16 = vmul.f32 0.003921569, %v198_v15 }
  0xd3   : > { %v201_v17 = vadd.f32 1e-05, %v200_v16 }
  0xd5   : > { %405 = vrsqrt.f32 %v201_v17 }
  0xdf   : > { %v406_v20 = vpop.eup %405 }
  0xe0   : > { %v204_v21 = vmul.f32 %v406_v20, %v203_v19 }
  0xe2   : > { %v205_v22 = vmul.f32 %v204_v21, %v196_v12 }
  0xe4   : > { %207 = vrot.lane.b32.xlu1 %v205_v22, %s508_s5 }
  0xe8   : > { %213 = vperm.xlu1 %402, %v204_v21  }
 0x156   : > { %v208_v23 = vpop.permute.xlu1 %207 }
 0x157   : > { %v210_v24 = vsub.f32 %v203_v19, %v208_v23 }
 0x159   : > { %226 = vperm.xlu0 %403, %v210_v24  }
 0x167   : > { %v214_v31 = vpop.permute.xlu1 %213 }
 0x168   : > { %v221_v32 = vrot.slane %v214_v31, %v220_v30 }
 0x16a   : > { %v223_v34 = vmul.f32 %v221_v32, %v177_v0 }
 0x1d8   : > { %v227_v33 = vpop.permute.xlu0 %226 }
 0x1d9   : > { %v234_v35 = vrot.slane %v227_v33, %v220_v30 }
 0x1db   : > { %v236_v36 = vadd.f32 %v234_v35, %v223_v34 }
 0x1dd   : > { %237 = vst [vmem:[%s172_s7] sm:$0xff] %v236_v36 }
 0x1de   : > { %450 = shalt.err (!%p447_p5)
}
 0x1df   : > { %s451_s25 = scalar_lea.hbm %s652_s17, 128  ;;  %s455_s20 = scalar_lea.hbm %s698_s2, 256 }
 0x1e0   : > { %p452_p8 = scmp.ne.s32.totalorder %s652_s17, %s451_s25  ;;  %p456_p1 = scmp.lt.u32.totalorder %s652_s17, %s698_s2 }
 0x1e1   : > { %p457_p3 = scmp.lt.u32.totalorder %s455_s20, %s451_s25  ;;  %p459_p11 = scmp.lt.u32.totalorder %s451_s25, %s652_s17 }
 0x1e2   : > { %p453_p9 = pnand %p452_p8, %p707_p12 }
 0x1e3   : > { %p458_p6 = por %p457_p3, %p456_p1 }
 0x1e4   : > { %p454_p0 = pneg %p453_p9 }
 0x1e5   : > { %p460_p13 = por %p459_p11, %p458_p6 }
 0x1e7   : > { %p461_p7 = pnand %p460_p13, %p454_p0 }
 0x1e9   : > { %464 = shalt.err (!%p461_p7)
}
 0x1ea   : > { %354 = dma.vmem_to_hbm [thread:$0]  (%p707_p12), %s654_s8, 128, %s652_s17, %s239_s19  }
 0x1eb PF: > { %s265_s3 = sand.u32 1, %s491_s9   ;;  %p708_p10 = scmp.ne.s32.totalorder %s703_s22, 0 }
 0x1ec   : > { %p709_p2 = scmp.ge.s32.totalorder %s503_s12, 2  ;;  %s266_s4 = scalar_lea.sflag [#allocation4], %s265_s3 }
 0x1ee   : > { %p361_p4 = pnand %p709_p2, %p708_p10 }
 0x1f0   : > { %486 = dma.done.wait (!%p361_p4), %s266_s4, 128  }
 0x1f1   : > { %488 = vsyncadd (!%p361_p4), %s266_s4, 4294967168  ;;  %p15_p5 = scmp.ge.s32.totalorder %s551_s15, 4   ;;  %s710_s9 = smov %s495_s10 }
 0x1f2   : > { %s711_s10 = smov %s499_s11  ;;  %s712_s11 = smov %s563_s18 }
 0x1f3   : > { %s713_s12 = smov %s551_s15  ;;  %17 = sbr.rel (!%p15_p5) target bundleno = 5 (0x5), region = 76 }
 0x1fa   :  { %271 = vsyncpa [#allocation3], 1 }
 0x1fb   :  { %273 = vsyncpa [#allocation3 + $0x1], 1 }
 0x1fc   :  { %274 = vsyncpa [#allocation4], 1 }
 0x1fd   :  { %276 = vsyncpa [#allocation4 + $0x1], 1 }

</bundles_post_ra>
